<compile_context>
chip_gen: v7x
topology: tpu7x:2x2x1
jax: 0.10.0
libtpu: 0.0.40
codegen_flags: <defaults>
</compile_context>

<pallas_src>
import functools

import jax
import jax.numpy as jnp
from jax import lax
from jax.experimental import pallas as pl
from jax.experimental.pallas import tpu as pltpu


def parallel_model_kernel(x_ref, w1_ref, b1_ref, w2a_ref, w2b_ref, b2_ref,
                          out_ref, *, n_records):
    # x_ref: [TB*(N+1), F]  dense 2-D slab; per batch group: N example records
    #        followed by the record_to_classify.
    x = x_ref[...]
    w1 = w1_ref[...]            # [F, H]
    b1 = b1_ref[...]            # [1, H]
    w2a = w2a_ref[...]          # [1, H]  classifier weight for the "average" half (pre-scaled by 1/N)
    w2b = w2b_ref[...]          # [1, H]  classifier weight for the "one_output" half
    b2 = b2_ref[0, 0]           # scalar bias from SMEM

    M = x.shape[0]              # TB * (N+1)
    NP1 = n_records + 1
    TB = M // NP1

    # --- sub_net on all rows at once: single fused MXU matmul + VPU ReLU ---
    h = jnp.dot(x, w1, preferred_element_type=jnp.float32) + b1
    h = jnp.maximum(h, 0.0)                                     # [M, H] f32

    # --- per-row / per-group index masks (iota + compare only; no div/mod) ---
    ridx = lax.broadcasted_iota(jnp.int32, (M, TB), 0)          # global row index j
    bidx = lax.broadcasted_iota(jnp.int32, (M, TB), 1)          # local batch index b
    lo = bidx * NP1
    in_group = (ridx >= lo) & (ridx < lo + NP1)                 # [M, TB] row j belongs to batch b
    is_rec_2d = ridx == lo + NP1 - 1                            # [M, TB] row j is the record row of b
    sel = in_group.astype(jnp.float32)                          # [M, TB]
    rec_mask = jnp.sum(is_rec_2d.astype(jnp.float32),
                       axis=1, keepdims=True)                   # [M, 1]  1.0 on record rows

    # --- per-row classifier dot: VPU multiply + lane reduce (no concat) ---
    wrow = rec_mask * w2b + (1.0 - rec_mask) * w2a              # [M, H] per-row weight
    contrib = jnp.sum(h * wrow, axis=1, keepdims=True)          # [M, 1]

    # --- tiny selector segment-sum per batch group, lane-dense logits ---
    logits = jnp.sum(sel * contrib, axis=0, keepdims=True) + b2 # [1, TB]
    out_ref[...] = jax.nn.sigmoid(logits)


def parallel_model(example_records, record_to_classify, w1, b1, w2, b2,
                   *, matmul_dtype=jnp.float32):
    B, N, F = example_records.shape
    H = w1.shape[1]
    NP1 = N + 1

    # Stack record_to_classify as the (N+1)-th record of each batch group and
    # flatten to a dense 2-D slab: one MXU matmul, no padded 3-D tiles.
    x = jnp.concatenate([example_records, record_to_classify[:, None, :]], axis=1)
    x2d = x.reshape(B * NP1, F)                                  # [B*(N+1), F]

    # Split the classifier weight (no in-kernel lane-axis concat) and fold the
    # 1/N averaging into the "average" half.
    w2a = (w2[:H, 0] / N).reshape(1, H)
    w2b = w2[H:, 0].reshape(1, H)

    # Optional bf16 operands for the MXU matmul (ReLU/classifier/sigmoid stay
    # f32 via preferred_element_type).  Off at toy sizes for 1e-5 parity.
    if matmul_dtype != jnp.float32:
        x2d = x2d.astype(matmul_dtype)
        w1 = w1.astype(matmul_dtype)

    # One batch tile per grid step at toy sizes.  When B scales: pick the
    # largest TB whose double-buffered x tile (2 * TB*(N+1)*F*itemsize) plus
    # weights fits the scoped VMEM budget (16 MiB v5e / 32 MiB v6e / 32-of-64
    # MiB v7x, raise via vmem_limit_bytes), keep the grid >= 2 so the
    # "parallel" axis shards across v7x's two TensorCores, and consider
    # pipeline_mode=pl.Buffered(1) on the grid-invariant weight specs.
    TB = B
    assert B % TB == 0, "kernel has no ragged-tile masking; TB must divide B"
    num_tiles = B // TB

    b2_smem = jnp.asarray(b2, dtype=jnp.float32).reshape(1, 1)

    kernel = functools.partial(parallel_model_kernel, n_records=N)

    out = pl.pallas_call(
        kernel,
        out_shape=jax.ShapeDtypeStruct((num_tiles, TB), jnp.float32),
        grid=(num_tiles,),
        in_specs=[
            pl.BlockSpec((TB * NP1, F), lambda i: (i, 0)),       # x slab per batch tile
            pl.BlockSpec((F, H), lambda i: (0, 0)),              # w1 (grid-invariant)
            pl.BlockSpec((1, H), lambda i: (0, 0)),              # b1
            pl.BlockSpec((1, H), lambda i: (0, 0)),              # w2a (avg half, /N folded)
            pl.BlockSpec((1, H), lambda i: (0, 0)),              # w2b (record half)
            pl.BlockSpec(memory_space=pltpu.MemorySpace.SMEM),   # b2 scalar
        ],
        out_specs=pl.BlockSpec((1, TB), lambda i: (i, 0)),       # lane-dense logits row
        compiler_params=pltpu.CompilerParams(dimension_semantics=("parallel",)),
    )(x2d, w1, b1, w2a, w2b, b2_smem)

    return out.reshape(-1)   # .view(-1) in the PyTorch module


def reference(example_records, record_to_classify, w1, b1, w2, b2):
    """Pure-JAX reference mirroring the PyTorch forward exactly."""
    B, N, F = example_records.shape
    sub = lambda x: jnp.maximum(x @ w1 + b1, 0.0)
    n_outputs = [sub(example_records[:, i, :]) for i in range(N)]
    one_outputs = sub(record_to_classify)
    average_outputs = jnp.mean(jnp.stack(n_outputs, axis=0), axis=0)
    feats = jnp.concatenate([average_outputs, one_outputs], axis=1)
    return jax.nn.sigmoid(feats @ w2 + b2).reshape(-1)


if __name__ == "__main__":
    B, N, F, H = 2, 8, 32, 32   # batch, num example records, num_fields, hidden

    key = jax.random.PRNGKey(0)
    k_ex, k_rec, k_w1, k_b1, k_w2, k_b2 = jax.random.split(key, 6)

    example_records = jax.random.normal(k_ex, (B, N, F), dtype=jnp.float32)
    record_to_classify = jax.random.normal(k_rec, (B, F), dtype=jnp.float32)

    # Deterministic parameter init (synthetic weights, Linear-style scaling)
    w1 = jax.random.normal(k_w1, (F, H), dtype=jnp.float32) / jnp.sqrt(F)
    b1 = jax.random.normal(k_b1, (1, H), dtype=jnp.float32) * 0.01
    w2 = jax.random.normal(k_w2, (2 * H, 1), dtype=jnp.float32) / jnp.sqrt(2 * H)
    b2 = jax.random.normal(k_b2, (1, 1), dtype=jnp.float32) * 0.01

    out = parallel_model(example_records, record_to_classify, w1, b1, w2, b2)
    out = jax.block_until_ready(out)

    ref = reference(example_records, record_to_classify, w1, b1, w2, b2)
    assert out.shape == (B,), out.shape
    assert jnp.allclose(out, ref, atol=1e-5, rtol=1e-5), (out, ref)

    print("KERNEL_OK")
</pallas_src>

<mosaic_0001>
module attributes {stable_mosaic.version = 11 : i64} {
  func.func @parallel_model_kernel(%arg0: i32, %arg1: memref<18x32xf32, #tpu.memory_space<vmem>>, %arg2: memref<32x32xf32, #tpu.memory_space<vmem>>, %arg3: memref<1x32xf32, #tpu.memory_space<vmem>>, %arg4: memref<1x32xf32, #tpu.memory_space<vmem>>, %arg5: memref<1x32xf32, #tpu.memory_space<vmem>>, %arg6: memref<1x1xf32, #tpu.memory_space<smem>>, %arg7: memref<1x2xf32, #tpu.memory_space<vmem>>) attributes {dimension_semantics = [#tpu.dimension_semantics<parallel>], iteration_bounds = array<i64: 1>, scalar_prefetch = 0 : i64, scratch_operands = 0 : i64, tpu.core_type = #tpu.core_type<tc>, window_params = [{transform_indices = @transform_0, window_bounds = array<i64: 18, 32>}, {pipeline_mode = #tpu.pipeline_mode<synchronous>, transform_indices = @transform_1, window_bounds = array<i64: 32, 32>}, {pipeline_mode = #tpu.pipeline_mode<synchronous>, transform_indices = @transform_2, window_bounds = array<i64: 1, 32>}, {pipeline_mode = #tpu.pipeline_mode<synchronous>, transform_indices = @transform_3, window_bounds = array<i64: 1, 32>}, {pipeline_mode = #tpu.pipeline_mode<synchronous>, transform_indices = @transform_4, window_bounds = array<i64: 1, 32>}, {transform_indices = @transform_5, window_bounds = array<i64: 1, 1>}, {transform_indices = @transform_6, window_bounds = array<i64: 1, 2>}]} {
    %c0 = arith.constant 0 : index
    %c0_0 = arith.constant 0 : index
    %0 = vector.load %arg1[%c0, %c0_0] : memref<18x32xf32, #tpu.memory_space<vmem>>, vector<18x32xf32>
    %c0_1 = arith.constant 0 : index
    %c0_2 = arith.constant 0 : index
    %1 = vector.load %arg2[%c0_1, %c0_2] : memref<32x32xf32, #tpu.memory_space<vmem>>, vector<32x32xf32>
    %c0_3 = arith.constant 0 : index
    %c0_4 = arith.constant 0 : index
    %2 = vector.load %arg3[%c0_3, %c0_4] : memref<1x32xf32, #tpu.memory_space<vmem>>, vector<1x32xf32>
    %c0_5 = arith.constant 0 : index
    %c0_6 = arith.constant 0 : index
    %3 = vector.load %arg4[%c0_5, %c0_6] : memref<1x32xf32, #tpu.memory_space<vmem>>, vector<1x32xf32>
    %c0_7 = arith.constant 0 : index
    %c0_8 = arith.constant 0 : index
    %4 = vector.load %arg5[%c0_7, %c0_8] : memref<1x32xf32, #tpu.memory_space<vmem>>, vector<1x32xf32>
    %c0_9 = arith.constant 0 : index
    %c0_10 = arith.constant 0 : index
    %5 = memref.load %arg6[%c0_9, %c0_10] : memref<1x1xf32, #tpu.memory_space<smem>>
    %cst = arith.constant dense<0.000000e+00> : vector<18x32xf32>
    %6 = tpu.matmul %0, %1, %cst {dimension_numbers = #tpu.dot_dimension_numbers<[1], [0], [0], [1], [0, 0, 1, 1], [], []>} : vector<18x32xf32>, vector<32x32xf32>, vector<18x32xf32> -> vector<18x32xf32>
    %7 = vector.broadcast %2 : vector<1x32xf32> to vector<18x32xf32>
    %8 = arith.addf %6, %7 : vector<18x32xf32>
    %cst_11 = arith.constant 0.000000e+00 : f32
    %9 = vector.broadcast %cst_11 : f32 to vector<18x32xf32>
    %10 = arith.maximumf %8, %9 : vector<18x32xf32>
    %11 = tpu.iota {dimensions = array<i32: 0>} : vector<18x2xi32>
    %12 = tpu.iota {dimensions = array<i32: 1>} : vector<18x2xi32>
    %c9_i32 = arith.constant 9 : i32
    %13 = vector.broadcast %c9_i32 : i32 to vector<18x2xi32>
    %14 = arith.muli %12, %13 : vector<18x2xi32>
    %15 = arith.cmpi sge, %11, %14 : vector<18x2xi32>
    %c9_i32_12 = arith.constant 9 : i32
    %16 = vector.broadcast %c9_i32_12 : i32 to vector<18x2xi32>
    %17 = arith.addi %14, %16 : vector<18x2xi32>
    %18 = arith.cmpi slt, %11, %17 : vector<18x2xi32>
    %19 = arith.andi %15, %18 : vector<18x2xi1>
    %c9_i32_13 = arith.constant 9 : i32
    %20 = vector.broadcast %c9_i32_13 : i32 to vector<18x2xi32>
    %21 = arith.addi %14, %20 : vector<18x2xi32>
    %c1_i32 = arith.constant 1 : i32
    %22 = vector.broadcast %c1_i32 : i32 to vector<18x2xi32>
    %23 = arith.subi %21, %22 : vector<18x2xi32>
    %24 = arith.cmpi eq, %11, %23 : vector<18x2xi32>
    %25 = arith.extui %19 : vector<18x2xi1> to vector<18x2xi32>
    %26 = arith.sitofp %25 : vector<18x2xi32> to vector<18x2xf32>
    %27 = arith.extui %24 : vector<18x2xi1> to vector<18x2xi32>
    %28 = arith.sitofp %27 : vector<18x2xi32> to vector<18x2xf32>
    %cst_14 = arith.constant dense<0.000000e+00> : vector<18xf32>
    %29 = vector.multi_reduction <add>, %28, %cst_14 [1] : vector<18x2xf32> to vector<18xf32>
    %30 = vector.shape_cast %29 : vector<18xf32> to vector<18x1xf32>
    %31 = vector.broadcast %30 : vector<18x1xf32> to vector<18x32xf32>
    %32 = vector.broadcast %4 : vector<1x32xf32> to vector<18x32xf32>
    %33 = arith.mulf %31, %32 : vector<18x32xf32>
    %cst_15 = arith.constant 1.000000e+00 : f32
    %34 = vector.broadcast %cst_15 : f32 to vector<18x1xf32>
    %35 = arith.subf %34, %30 : vector<18x1xf32>
    %36 = vector.broadcast %35 : vector<18x1xf32> to vector<18x32xf32>
    %37 = vector.broadcast %3 : vector<1x32xf32> to vector<18x32xf32>
    %38 = arith.mulf %36, %37 : vector<18x32xf32>
    %39 = arith.addf %33, %38 : vector<18x32xf32>
    %40 = arith.mulf %10, %39 : vector<18x32xf32>
    %cst_16 = arith.constant dense<0.000000e+00> : vector<18xf32>
    %41 = vector.multi_reduction <add>, %40, %cst_16 [1] : vector<18x32xf32> to vector<18xf32>
    %42 = vector.shape_cast %41 : vector<18xf32> to vector<18x1xf32>
    %43 = vector.broadcast %42 : vector<18x1xf32> to vector<18x2xf32>
    %44 = arith.mulf %26, %43 : vector<18x2xf32>
    %cst_17 = arith.constant dense<0.000000e+00> : vector<2xf32>
    %45 = vector.multi_reduction <add>, %44, %cst_17 [0] : vector<18x2xf32> to vector<2xf32>
    %46 = vector.shape_cast %45 : vector<2xf32> to vector<1x2xf32>
    %47 = vector.broadcast %5 : f32 to vector<1x2xf32>
    %48 = arith.addf %46, %47 : vector<1x2xf32>
    %49 = arith.negf %48 : vector<1x2xf32>
    %50 = math.exp %49 : vector<1x2xf32>
    %cst_18 = arith.constant 1.000000e+00 : f32
    %51 = vector.broadcast %cst_18 : f32 to vector<1x2xf32>
    %52 = arith.addf %51, %50 : vector<1x2xf32>
    %53 = arith.divf %51, %52 : vector<1x2xf32>
    %c0_19 = arith.constant 0 : index
    %c0_20 = arith.constant 0 : index
    %54 = vector.load %arg7[%c0_19, %c0_20] : memref<1x2xf32, #tpu.memory_space<vmem>>, vector<1x2xf32>
    tpu.vector_store %arg7[%c0_19, %c0_20], %53 {strides = array<i32>} : memref<1x2xf32, #tpu.memory_space<vmem>>, vector<1x2xf32>,
    return
  }
  func.func @transform_0(%arg0: i32) -> (i32, i32) {
    %c0_i32 = arith.constant 0 : i32
    %c0_i32_0 = arith.constant 0 : i32
    return %arg0, %c0_i32 : i32, i32
  }
  func.func @transform_1(%arg0: i32) -> (i32, i32) {
    %c0_i32 = arith.constant 0 : i32
    %c0_i32_0 = arith.constant 0 : i32
    %c0_i32_1 = arith.constant 0 : i32
    return %c0_i32, %c0_i32_0 : i32, i32
  }
  func.func @transform_2(%arg0: i32) -> (i32, i32) {
    %c0_i32 = arith.constant 0 : i32
    %c0_i32_0 = arith.constant 0 : i32
    %c0_i32_1 = arith.constant 0 : i32
    return %c0_i32, %c0_i32_0 : i32, i32
  }
  func.func @transform_3(%arg0: i32) -> (i32, i32) {
    %c0_i32 = arith.constant 0 : i32
    %c0_i32_0 = arith.constant 0 : i32
    %c0_i32_1 = arith.constant 0 : i32
    return %c0_i32, %c0_i32_0 : i32, i32
  }
  func.func @transform_4(%arg0: i32) -> (i32, i32) {
    %c0_i32 = arith.constant 0 : i32
    %c0_i32_0 = arith.constant 0 : i32
    %c0_i32_1 = arith.constant 0 : i32
    return %c0_i32, %c0_i32_0 : i32, i32
  }
  func.func @transform_5(%arg0: i32) -> (i32, i32) {
    %c0_i32 = arith.constant 0 : i32
    %c0_i32_0 = arith.constant 0 : i32
    %c0_i32_1 = arith.constant 0 : i32
    return %c0_i32, %c0_i32_0 : i32, i32
  }
  func.func @transform_6(%arg0: i32) -> (i32, i32) {
    %c0_i32 = arith.constant 0 : i32
    %c0_i32_0 = arith.constant 0 : i32
    return %arg0, %c0_i32 : i32, i32
  }
}

</mosaic_0001>

<bundles_post_ra>
// kernel: tpu_custom_call.1
= control target key start
LH: loop header
LB: loop body
LE: loop exit
PB: predicated region body
PF: predicated region fallthrough
CT: control target
= control target key end

     0   :  { %12 = vsyncpa [#allocation4], 0  ;;  %s559_s0 = inlined_call_operand.hbm [shape: f32[18,32], index: 0, kind: input, shape index: {}]   ;;  %s560_s1 = inlined_call_operand.hbm [shape: f32[32,32], index: 1, kind: input, shape index: {}]   ;;  %s561_s2 = inlined_call_operand.vmem [shape: f32[1,32], index: 2, kind: input, shape index: {}]   ;;  %s562_s3 = inlined_call_operand.vmem [shape: f32[1,32], index: 3, kind: input, shape index: {}]   ;;  %s563_s4 = inlined_call_operand.vmem [shape: f32[1,32], index: 4, kind: input, shape index: {}]   ;;  %s564_s5 = inlined_call_operand.<no memory space> [shape: f32[1,1], index: 5, kind: input, shape index: {}]   ;;  %s565_s6 = inlined_call_operand.hbm [shape: f32[1,2], index: 6, kind: output, shape index: {}]  }
   0x1   :  { %13 = vsyncpa [#allocation7], 0 }
   0x2   :  { %14 = vsyncpa [#allocation5], 0  ;;  %s416_s21 = smov [#allocation3]   ;;  %s344_s25 = scalar_lea.hbm %s559_s0, 384 }
   0x3   :  { %s20_s22 = sshll.u32 %s416_s21, 4  ;;  %p345_p0 = scmp.ne.s32.totalorder %s559_s0, %s344_s25  ;;  %s21_s22 = int_to_ptr.vmem [resolvable:$true] %s20_s22 }
   0x4   :  { %p348_p1 = scmp.lt.u32.totalorder %s344_s25, %s559_s0 }
   0x6   :  { %p350_p2 = pnand %p348_p1, %p345_p0 }
   0x8   :  { %353 = shalt.err (!%p350_p2)
}
   0x9   :  { %s354_s30 = scalar_lea.vmem %s21_s22, 384  ;;  %p359_p4 = scmp.lt.s32.totalorder %s21_s22, %s21_s22 }
   0xa   :  { %p355_p3 = scmp.ne.s32.totalorder %s21_s22, %s354_s30  ;;  %p360_p5 = scmp.lt.s32.totalorder %s354_s30, %s354_s30 }
   0xc   :  { %p361_p6 = por %p360_p5, %p359_p4 }
   0xe   :  { %p362_p7 = pnand %p361_p6, %p355_p3 }
  0x10   :  { %365 = shalt.err (!%p362_p7)
}
  0x11   :  { %s417_s7 = smov 128   ;;  %s418_s8 = smov 8  }
  0x12   :  { %26 = dma.hbm_to_vmem [thread:$0]  %s559_s0, 384, %s21_s22, [#allocation4], %s417_s7, %s417_s7, %s418_s8  }
  0x13   :  { %s419_s11 = smov [#allocation6]   ;;  %s366_s15 = scalar_lea.hbm %s560_s1, 512 }
  0x14   :  { %s32_s12 = sshll.u32 %s419_s11, 4  ;;  %p367_p8 = scmp.ne.s32.totalorder %s560_s1, %s366_s15  ;;  %s33_s12 = int_to_ptr.vmem [resolvable:$true] %s32_s12 }
  0x15   :  { %p370_p9 = scmp.lt.u32.totalorder %s366_s15, %s560_s1 }
  0x17   :  { %p372_p10 = pnand %p370_p9, %p367_p8 }
  0x19   :  { %375 = shalt.err (!%p372_p10)
}
  0x1a   :  { %s376_s20 = scalar_lea.vmem %s33_s12, 512  ;;  %p381_p12 = scmp.lt.s32.totalorder %s33_s12, %s33_s12 }
  0x1b   :  { %p377_p11 = scmp.ne.s32.totalorder %s33_s12, %s376_s20  ;;  %p382_p13 = scmp.lt.s32.totalorder %s376_s20, %s376_s20 }
  0x1d   :  { %p383_p0 = por %p382_p13, %p381_p12 }
  0x1f   :  { %p384_p1 = pnand %p383_p0, %p377_p11 }
  0x21   :  { %387 = shalt.err (!%p384_p1)
}
  0x22   :  { %38 = dma.hbm_to_vmem [thread:$0]  %s560_s1, 512, %s33_s12, [#allocation7], %s417_s7, %s417_s7, %s418_s8  }
  0x23   :  { %410 = dma.done.wait [#allocation4], 384  }
  0x24   :  { %411 = vsyncadd [#allocation4], 4294966912 }
  0x25   :  { %412 = dma.done.wait [#allocation7], 512  }
  0x26   :  { %413 = vsyncadd [#allocation7], 4294966784  ;;  %v420_v0 = vmov 0.0|0.0   ;;  %v163_v1 = vlaneseq  ;;  %vm421_vm0 = vmmov 0   ;;  %v422_v2 = vmov 0.0   ;;  %v56_v6 = vld [vmem:[#allocation6] sm:$0xff] }
  0x27   :  { %322 = vmatprep.subr.bf16.mxu0 %v420_v0  ;;  %328 = vmatprep.subr.bf16.mxu1 %v420_v0  ;;  %v57_v7 = vld [vmem:[#allocation6 + $0x8] sm:$0xff]  ;;  %v58_v8 = vld [vmem:[#allocation6 + $0x10] sm:$0xff]  ;;  %v59_v13 = vld [vmem:[#allocation6 + $0x18] sm:$0xff]  ;;  %vm196_vm1 = vcmask 15360   ;;  %vm203_vm2 = vcmask 9216   ;;  %vm70_vm6 = vcmask 261120  }
  0x28   :  { %313 = vmatprep.mubr.msk.f32.mxu0 %vm421_vm0, %v422_v2  ;;  %316 = vmatprep.mubr.msk.f32.mxu1 %vm421_vm0, %v422_v2  ;;  %v168_v3 = vand.u32 127, %v163_v1  ;;  %v487_v4 = vshrl.u32 %v163_v1, 7  ;;  %v323_v12 = vpack.c.bf16 %v57_v7, %v56_v6  ;;  %v326_v15 = vpack.c.bf16 %v59_v13, %v58_v8  ;;  %v53_v21 = vld [vmem:[#allocation3] sm:$0xff]  ;;  %v54_v22 = vld [vmem:[#allocation3 + $0x8] sm:$0xff]  ;;  %v55_v24 = vld [vmem:[#allocation3 + $0x10] sm:$0x3] }
  0x29   :  { %v296_v29 = vld [vmem:[%s562_s3] ss:$0 sm:$0xff]  ;;  %vm240_vm7 = vcmask 254976  }
  0x2a   :  { %v489_v5 = vmul.u32 9, %v168_v3  ;;  %v495_v10 = vadd.s32 8, %v487_v4  ;;  %v498_v11 = vadd.s32 16, %v487_v4  ;;  %324 = vmatpush3.bf16.msra.mxu0 %v323_v12  ;;  %330 = vmatpush3.bf16.msra.mxu1 %v323_v12  ;;  %v295_v30 = vld [vmem:[%s563_s4] ss:$0 sm:$0xff]  ;;  %s423_s4 = smov [#allocation8]  }
  0x2b   :  { %325 = vmatprep.subr.bf16.mxu0 %v420_v0  ;;  %329 = vmatprep.subr.bf16.mxu1 %v420_v0  ;;  %v284_v34 = vld [vmem:[%s561_s2] ss:$0 sm:$0xff]  ;;  %s274_s27 = sshll.u32 %s423_s4, 4  ;;  %s275_s27 = int_to_ptr.vmem [resolvable:$true] %s274_s27 }
  0x2c   :  { %v492_v9 = vadd.s32 9, %v489_v5  ;;  %vm171_vm8 = vcmp.ge.s32.totalorder %v495_v10, %v489_v5  ;;  %vm170_vm10 = vcmp.ge.s32.totalorder %v487_v4, %v489_v5  ;;  %vm172_vm14 = vcmp.ge.s32.totalorder %v498_v11, %v489_v5  ;;  %s388_s28 = scalar_lea.vmem %s275_s27, 16  ;;  %s392_s29 = scalar_lea.vmem %s275_s27, 32 }
  0x2d   :  { %p389_p2 = scmp.ne.s32.totalorder %s275_s27, %s388_s28  ;;  %p393_p3 = scmp.lt.s32.totalorder %s275_s27, %s275_s27 }
  0x2e   :  { %v288_v14 = vadd.s32 4294967295, %v492_v9  ;;  %327 = vmatpush3.bf16.msra.mxu0 %v326_v15  ;;  %331 = vmatpush3.bf16.msra.mxu1 %v326_v15  ;;  %vm175_vm9 = vcmp.lt.s32.totalorder %v495_v10, %v492_v9  ;;  %vm174_vm11 = vcmp.lt.s32.totalorder %v487_v4, %v492_v9  ;;  %vm176_vm15 = vcmp.lt.s32.totalorder %v498_v11, %v492_v9  ;;  %p394_p4 = scmp.lt.s32.totalorder %s392_s29, %s388_s28 }
  0x2f   :  { %vm178_vm12 = vmand %vm171_vm8, %vm175_vm9 }
  0x30   :  { %vm181_vm3 = vcmp.eq.s32.totalorder %v487_v4, %v288_v14  ;;  %vm182_vm4 = vcmp.eq.s32.totalorder %v495_v10, %v288_v14  ;;  %vm183_vm5 = vcmp.eq.s32.totalorder %v498_v11, %v288_v14  ;;  %vm177_vm13 = vmand %vm170_vm10, %vm174_vm11  ;;  %v290_v61 = vsel %vm178_vm12, 1.0, %v422_v2  ;;  %p395_p5 = por %p394_p4, %p393_p3 }
  0x31   :  { %v292_v16 = vsel %vm181_vm3, 1.0, %v422_v2  ;;  %v294_v17 = vsel %vm183_vm5, 1.0, %v422_v2  ;;  %v293_v19 = vsel %vm182_vm4, 1.0, %v422_v2  ;;  %314 = vmatmul.mubr.msk.f32.vlgmr.msra.gmra.mrb[0].mxu0 %vm70_vm6, %v53_v21  ;;  %317 = vmatmul.mubr.msk.f32.vlgmr.msra.gmra.mrb[0].mxu1 %vm70_vm6, %v54_v22  ;;  %v289_v62 = vsel %vm177_vm13, 1.0, %v422_v2 }
  0x32   :  { %v197_v18 = vsel %vm196_vm1, %v292_v16, 0.0  ;;  %v204_v20 = vsel %vm203_vm2, %v294_v17, 0.0  ;;  %v200_v23 = vsel %vm196_vm1, %v293_v19, 0.0  ;;  %319 = vmatprep.mubr.msk.f32.mxu1 %vm421_vm0, %v422_v2  ;;  %vm179_vm0 = vmand %vm172_vm14, %vm176_vm15  ;;  %v258_v17 = vstv %s564_s5  ;;  %p396_p6 = pnand %p395_p5, %p389_p2 }
  0x33   :  { %198 = vadd.xlane.f32.xlu0 %v197_v18  ;;  %205 = vadd.xlane.f32.xlu1 %v204_v20  ;;  %v291_v6 = vsel %vm179_vm0, 1.0, %v422_v2 }
  0x35   :  { %320 = vmatmul.mubr.msk.f32.gmra.mrb[2].mxu1 %vm70_vm6, %v55_v24 }
  0x37   :  { %201 = vadd.xlane.f32.xlu0 %v200_v23 }
  0xc0   :  { %v199_v25 = vpop.xlane.xlu0 %198  ;;  %v206_v31 = vpop.xlane.xlu1 %205 }
  0xc1   :  { %v216_v28 = vsub.f32 1.0, %v199_v25  ;;  %v213_v35 = vmul.f32 %v295_v30, %v199_v25  ;;  %v218_v37 = vsub.f32 1.0, %v206_v31  ;;  %v215_v45 = vmul.f32 %v295_v30, %v206_v31 }
  0xc3   :  { %v225_v36 = vmul.f32 %v296_v29, %v216_v28  ;;  %v227_v47 = vmul.f32 %v296_v29, %v218_v37 }
  0xc4   :  { %v202_v26 = vpop.xlane.xlu0 %201 }
  0xc5   :  { %v217_v27 = vsub.f32 1.0, %v202_v26  ;;  %v214_v32 = vmul.f32 %v295_v30, %v202_v26  ;;  %v228_v46 = vadd.f32 %v225_v36, %v213_v35  ;;  %v230_v55 = vadd.f32 %v227_v47, %v215_v45 }
  0xc7   :  { %v226_v33 = vmul.f32 %v296_v29, %v217_v27 }
  0xc9   :  { %v229_v40 = vadd.f32 %v226_v33, %v214_v32 }
 0x104   :  { %v146_v38 = vpop.f32.mrb[0].mxu0  ;;  %v151_v39 = vpop.f32.mrb[0].mxu1 }
 0x105   :  { %v147_v41 = vadd.f32 %v284_v34, %v146_v38  ;;  %v152_v42 = vadd.f32 %v284_v34, %v151_v39  ;;  %v315_v43 = vpop.f32.mrb[1].mxu0  ;;  %v318_v44 = vpop.f32.mrb[1].mxu1 }
 0x107   :  { %v160_v48 = vmax.f32 %v147_v41, 0.0  ;;  %v161_v49 = vmax.f32 %v152_v42, 0.0 }
 0x108   :  { %v156_v50 = vpop.f32.mrb[2].mxu1 }
 0x109   :  { %v157_v51 = vadd.f32 %v284_v34, %v156_v50  ;;  %v321_v52 = vpop.f32.mrb[3].mxu1  ;;  %v232_v53 = vmul.f32 %v229_v40, %v161_v49  ;;  %v231_v54 = vmul.f32 %v228_v46, %v160_v48 }
 0x10b   :  { %v162_v56 = vmax.f32 %v157_v51, 0.0  ;;  %v237_v57 = vsel %vm70_vm6, %v232_v53, 0.0  ;;  %v234_v58 = vsel %vm70_vm6, %v231_v54, 0.0 }
 0x10c   :  { %238 = vadd.xlane.f32.xlu0 %v237_v57  ;;  %235 = vadd.xlane.f32.xlu1 %v234_v58 }
 0x10d   :  { %v233_v59 = vmul.f32 %v230_v55, %v162_v56 }
 0x10f   :  { %v241_v60 = vsel %vm240_vm7, %v233_v59, 0.0 }
 0x110   :  { %242 = vadd.xlane.f32.xlu1 %v241_v60 }
 0x199   :  { %v239_v63 = vpop.xlane.xlu0 %238  ;;  %v236_v0 = vpop.xlane.xlu1 %235 }
 0x19a   :  { %v245_v1 = vmul.f32 %v290_v61, %v239_v63  ;;  %v244_v3 = vmul.f32 %v289_v62, %v236_v0 }
 0x19c   :  { %v248_v4 = vsel %vm196_vm1, %v245_v1, 0.0  ;;  %v247_v7 = vsel %vm196_vm1, %v244_v3, 0.0  ;;  %vm266_vm1 = vcmask 8192  }
 0x19d   :  { %v243_v8 = vpop.xlane.xlu1 %242  ;;  %v249_v10 = vadd.f32 %v248_v4, %v247_v7 }
 0x19e   :  { %v246_v5 = vmul.f32 %v291_v6, %v243_v8 }
 0x1a0   :  { %v250_v9 = vsel %vm203_vm2, %v246_v5, 0.0 }
 0x1a1   :  { %v251_v11 = vadd.f32 %v250_v9, %v249_v10 }
 0x1a3   :  { %v252_v12 = vrot.slane %v251_v11, 4 }
 0x1a5   :  { %v253_v13 = vadd.f32 %v252_v12, %v251_v11 }
 0x1a7   :  { %v254_v14 = vrot.slane %v253_v13, 2 }
 0x1a9   :  { %v255_v15 = vadd.f32 %v254_v14, %v253_v13 }
 0x1ab   :  { %v256_v16 = vrot.slane %v255_v15, 1 }
 0x1ad   :  { %v257_v2 = vadd.f32 %v256_v16, %v255_v15 }
 0x1af   :  { %v259_v18 = vadd.f32 %v258_v17, %v257_v2 }
 0x1b1   :  { %v297_v19 = vmul.f32 -1.442695, %v259_v18 }
 0x1b3   :  { %340 = vpow2.f32 %v297_v19 }
 0x1bd   :  { %v341_v20 = vpop.eup %340 }
 0x1be   :  { %v263_v21 = vadd.f32 1.0, %v341_v20 }
 0x1c0   :  { %342 = vrcp.f32 %v263_v21 }
 0x1ca   :  { %v343_v22 = vpop.eup %342 }
 0x1cb   :  { %267 = vst.msk [vmem:[#allocation8] sm:$0x1] %vm266_vm1, %v343_v22 }
 0x1cc   :  { %399 = shalt.err (!%p396_p6)
}
 0x1cd   :  { %s400_s7 = scalar_lea.hbm %s565_s6, 16 }
 0x1ce   :  { %p401_p7 = scmp.ne.s32.totalorder %s565_s6, %s400_s7  ;;  %p404_p8 = scmp.lt.u32.totalorder %s400_s7, %s565_s6 }
 0x1d0   :  { %p406_p9 = pnand %p404_p8, %p401_p7 }
 0x1d2   :  { %409 = shalt.err (!%p406_p9)
}
 0x1d3   :  { %277 = dma.vmem_to_hbm [thread:$0]  %s275_s27, 16, %s565_s6, [#allocation5]  }
 0x1d4   :  { %414 = dma.done.wait [#allocation5], 16  }
 0x1d5   :  { %415 = vsyncadd [#allocation5], 4294967280 }
 0x1d6   :  { %281 = vsyncpa [#allocation4], 1 }
 0x1d7   :  { %282 = vsyncpa [#allocation7], 1 }
 0x1d8   :  { %283 = vsyncpa [#allocation5], 1 }

</bundles_post_ra>
